<compile_context>
chip_gen: v7x
topology: tpu7x:2x2x1
jax: 0.10.0
libtpu: 0.0.40
codegen_flags: <defaults>
</compile_context>

<pallas_src>
import math

import jax
import jax.numpy as jnp
from jax.experimental import pallas as pl
from jax.experimental.pallas import tpu as pltpu

LN_EPS = 1e-5                       # nn.LayerNorm default
NEG_INF = -1e30                     # finite -inf: no NaNs even if a row is fully masked
VMEM_LIMIT = 48 * 1024 * 1024       # > 16/32 MiB scoped defaults, < v7x 64 MiB physical


def _layernorm(x, g, b):
    x = x.astype(jnp.float32)
    mu = jnp.mean(x, axis=-1, keepdims=True)
    var = jnp.mean(jnp.square(x - mu), axis=-1, keepdims=True)
    return (x - mu) * jax.lax.rsqrt(var + LN_EPS) * g.astype(jnp.float32) + b.astype(jnp.float32)


def _const_spec(shape):
    n = len(shape)
    return pl.BlockSpec(shape, lambda *args, _n=n: (0,) * _n)


# ---------------------------------------------------------------------------
# Kernel 1: LN1 + fused QKV projection, head-major outputs.
# ---------------------------------------------------------------------------
def qkv_kernel(x_ref, g_ref, b_ref, wqkv_ref, bqkv_ref, q_ref, k_ref, v_ref):
    x = x_ref[0]                                   # (tt, C)
    C = x.shape[-1]
    n_head = q_ref.shape[1]
    D = C // n_head
    h = _layernorm(x, g_ref[...], b_ref[...])
    w = wqkv_ref[...]
    qkv = jnp.dot(h.astype(w.dtype), w, preferred_element_type=jnp.float32)
    qkv = qkv + bqkv_ref[...].astype(jnp.float32)  # (tt, 3C)
    for hh in range(n_head):                       # static, small
        q_ref[0, hh] = qkv[:, hh * D:(hh + 1) * D].astype(q_ref.dtype)
        k_ref[0, hh] = qkv[:, C + hh * D:C + (hh + 1) * D].astype(k_ref.dtype)
        v_ref[0, hh] = qkv[:, 2 * C + hh * D:2 * C + (hh + 1) * D].astype(v_ref.dtype)


def run_qkv(x, ln1_g, ln1_b, w_qkv, b_qkv, n_head, *, seq_tile):
    B, T, C = x.shape
    D = C // n_head
    tt = min(T, seq_tile)
    assert T % tt == 0
    o_shape = jax.ShapeDtypeStruct((B, n_head, T, D), x.dtype)
    o_spec = pl.BlockSpec((1, n_head, tt, D), lambda b, t: (b, 0, t, 0))
    isz = jnp.dtype(x.dtype).itemsize
    return pl.pallas_call(
        qkv_kernel,
        out_shape=(o_shape, o_shape, o_shape),
        grid=(B, T // tt),
        in_specs=[
            pl.BlockSpec((1, tt, C), lambda b, t: (b, t, 0)),
            _const_spec(ln1_g.shape), _const_spec(ln1_b.shape),
            _const_spec(w_qkv.shape), _const_spec(b_qkv.shape),
        ],
        out_specs=(o_spec, o_spec, o_spec),
        compiler_params=pltpu.CompilerParams(
            dimension_semantics=("parallel", "parallel"),
            vmem_limit_bytes=VMEM_LIMIT),
        cost_estimate=pl.CostEstimate(
            flops=int(2 * B * T * C * 3 * C),
            transcendentals=int(B * T),
            bytes_accessed=int(isz * (4 * B * T * C + 3 * C * C + 3 * C))),
    )(x, ln1_g, ln1_b, w_qkv, b_qkv)


# ---------------------------------------------------------------------------
# Kernel 2: causal flash attention, all heads batched in one einsum per tile.
# ---------------------------------------------------------------------------
def attn_kernel(q_ref, k_ref, v_ref, y_ref, m_s, l_s, acc_s):
    qi = pl.program_id(1)
    ki = pl.program_id(2)
    tq = q_ref.shape[2]
    tk = k_ref.shape[2]
    D = q_ref.shape[3]
    scale = 1.0 / math.sqrt(D)

    @pl.when(ki == 0)
    def _():
        m_s[...] = jnp.full_like(m_s, NEG_INF)
        l_s[...] = jnp.zeros_like(l_s)
        acc_s[...] = jnp.zeros_like(acc_s)

    q_start = qi * tq
    k_start = ki * tk

    # Skip kv tiles that lie entirely above the causal diagonal.
    @pl.when(k_start <= q_start + (tq - 1))
    def _():
        q = q_ref[0]                               # (H, tq, D)
        k = k_ref[0]                               # (H, tk, D)
        v = v_ref[0]                               # (H, tk, D)
        s = jnp.einsum('hqd,hkd->hqk', q, k,
                       preferred_element_type=jnp.float32) * scale   # (H, tq, tk)
        q_pos = q_start + jax.lax.broadcasted_iota(jnp.int32, (tq, tk), 0)
        k_pos = k_start + jax.lax.broadcasted_iota(jnp.int32, (tq, tk), 1)
        causal = q_pos >= k_pos
        s = jnp.where(causal[None, :, :], s, NEG_INF)

        m_prev = m_s[...]                          # (H, tq, 1)
        m_new = jnp.maximum(m_prev, jnp.max(s, axis=-1, keepdims=True))
        alpha = jnp.exp(m_prev - m_new)
        p = jnp.exp(s - m_new)
        l_s[...] = alpha * l_s[...] + jnp.sum(p, axis=-1, keepdims=True)
        acc_s[...] = alpha * acc_s[...] + jnp.einsum(
            'hqk,hkd->hqd', p.astype(v.dtype), v,
            preferred_element_type=jnp.float32)
        m_s[...] = m_new

    @pl.when(ki == pl.num_programs(2) - 1)
    def _():
        inv_l = pl.reciprocal(l_s[...], approx=True)
        y_ref[0] = (acc_s[...] * inv_l).astype(y_ref.dtype)


def run_attention(q, k, v, *, q_tile, kv_tile):
    B, H, T, D = q.shape
    tq = min(T, q_tile)
    tk = min(T, kv_tile)
    assert T % tq == 0 and T % tk == 0
    q_spec = pl.BlockSpec((1, H, tq, D), lambda b, qi, ki: (b, 0, qi, 0))
    kv_spec = pl.BlockSpec((1, H, tk, D), lambda b, qi, ki: (b, 0, ki, 0))
    isz = jnp.dtype(q.dtype).itemsize
    return pl.pallas_call(
        attn_kernel,
        out_shape=jax.ShapeDtypeStruct((B, H, T, D), q.dtype),
        grid=(B, T // tq, T // tk),
        in_specs=[q_spec, kv_spec, kv_spec],
        out_specs=pl.BlockSpec((1, H, tq, D), lambda b, qi, ki: (b, 0, qi, 0)),
        scratch_shapes=[
            pltpu.VMEM((H, tq, 1), jnp.float32),   # running max
            pltpu.VMEM((H, tq, 1), jnp.float32),   # running denom
            pltpu.VMEM((H, tq, D), jnp.float32),   # running numerator
        ],
        compiler_params=pltpu.CompilerParams(
            dimension_semantics=("parallel", "parallel", "arbitrary"),
            vmem_limit_bytes=VMEM_LIMIT),
        cost_estimate=pl.CostEstimate(
            flops=int(2 * B * H * T * T * D),      # causal: ~half of dense 4*B*H*T*T*D
            transcendentals=int(B * H * T * T // 2),
            bytes_accessed=int(isz * 4 * B * H * T * D)),
    )(q, k, v)


# ---------------------------------------------------------------------------
# Kernel 3: attention output proj + residual-1 + LN2 + tiled MLP + residual-2.
# ---------------------------------------------------------------------------
def mlp_kernel(x_ref, y_ref, wp_ref, bp_ref, ln2_g_ref, ln2_b_ref,
               w1_ref, b1_ref, w2_ref, b2_ref,
               o_ref, x1_s, h_s, acc_s):
    fi = pl.program_id(2)
    n_head = y_ref.shape[1]

    @pl.when(fi == 0)
    def _():
        # Re-interleave heads into (tt, C), project, residual-1, LN2 — once.
        att = jnp.concatenate([y_ref[0, hh] for hh in range(n_head)], axis=-1)
        wp = wp_ref[...]
        proj = jnp.dot(att.astype(wp.dtype), wp, preferred_element_type=jnp.float32)
        proj = proj + bp_ref[...].astype(jnp.float32)
        x1 = x_ref[0].astype(jnp.float32) + proj
        x1_s[...] = x1
        h_s[...] = _layernorm(x1, ln2_g_ref[...], ln2_b_ref[...])
        acc_s[...] = jnp.zeros_like(acc_s)

    # One (C, tf) slab of the hidden dimension per grid step.
    w1 = w1_ref[...]
    hidden = jnp.dot(h_s[...].astype(w1.dtype), w1, preferred_element_type=jnp.float32)
    hidden = hidden + b1_ref[...].astype(jnp.float32)
    hidden = jax.nn.gelu(hidden, approximate=False)          # exact erf == nn.GELU()
    w2 = w2_ref[...]
    acc_s[...] += jnp.dot(hidden.astype(w2.dtype), w2, preferred_element_type=jnp.float32)

    @pl.when(fi == pl.num_programs(2) - 1)
    def _():
        out = x1_s[...] + acc_s[...] + b2_ref[...].astype(jnp.float32)
        o_ref[0] = out.astype(o_ref.dtype)


def run_mlp(x, y_attn, w_proj, b_proj, ln2_g, ln2_b, w1, b1, w2, b2, n_head,
            *, seq_tile, ff_tile):
    B, T, C = x.shape
    H = n_head
    D = C // H
    F = w1.shape[1]
    tt = min(T, seq_tile)
    tf = min(F, ff_tile)
    assert T % tt == 0 and F % tf == 0
    isz = jnp.dtype(x.dtype).itemsize
    return pl.pallas_call(
        mlp_kernel,
        out_shape=jax.ShapeDtypeStruct((B, T, C), x.dtype),
        grid=(B, T // tt, F // tf),
        in_specs=[
            pl.BlockSpec((1, tt, C), lambda b, t, f: (b, t, 0)),
            pl.BlockSpec((1, H, tt, D), lambda b, t, f: (b, 0, t, 0)),
            _const_spec(w_proj.shape), _const_spec(b_proj.shape),
            _const_spec(ln2_g.shape), _const_spec(ln2_b.shape),
            pl.BlockSpec((C, tf), lambda b, t, f: (0, f)),
            pl.BlockSpec((1, tf), lambda b, t, f: (0, f)),
            pl.BlockSpec((tf, C), lambda b, t, f: (f, 0)),
            _const_spec(b2.shape),
        ],
        out_specs=pl.BlockSpec((1, tt, C), lambda b, t, f: (b, t, 0)),
        scratch_shapes=[
            pltpu.VMEM((tt, C), jnp.float32),      # x1 (post-residual-1)
            pltpu.VMEM((tt, C), jnp.float32),      # LN2(x1)
            pltpu.VMEM((tt, C), jnp.float32),      # MLP accumulator
        ],
        compiler_params=pltpu.CompilerParams(
            dimension_semantics=("parallel", "parallel", "arbitrary"),
            vmem_limit_bytes=VMEM_LIMIT),
        cost_estimate=pl.CostEstimate(
            flops=int(2 * B * T * C * (C + 2 * F)),
            transcendentals=int(B * T * (F + 1)),
            bytes_accessed=int(isz * (3 * B * T * C + C * C + 2 * C * F))),
    )(x, y_attn, w_proj, b_proj, ln2_g, ln2_b, w1, b1, w2, b2)


# ---------------------------------------------------------------------------
# Block forward + params
# ---------------------------------------------------------------------------
def block_forward(x, params, *, seq_tile=256, q_tile=128, kv_tile=128, ff_tile=512):
    n_head = params["n_head"]
    assert x.shape[-1] % n_head == 0
    q, k, v = run_qkv(x, params["ln1_g"], params["ln1_b"],
                      params["w_qkv"], params["b_qkv"], n_head, seq_tile=seq_tile)
    y = run_attention(q, k, v, q_tile=q_tile, kv_tile=kv_tile)
    return run_mlp(x, y, params["w_proj"], params["b_proj"],
                   params["ln2_g"], params["ln2_b"],
                   params["w1"], params["b1"], params["w2"], params["b2"],
                   n_head, seq_tile=seq_tile, ff_tile=ff_tile)


def init_block_params(key, *, n_embd, n_head, param_dtype=jnp.float32):
    # param_dtype=jnp.bfloat16 recommended on v6e/v7x (f32 accumulation kept
    # in-kernel); f32 here so the demo matches the reference exactly.
    C = n_embd
    ks = jax.random.split(key, 8)
    std = 0.02

    def w(k_, fi, fo):
        return (std * jax.random.normal(k_, (fi, fo), jnp.float32)).astype(param_dtype)

    def b(k_, n):
        return (std * jax.random.normal(k_, (1, n), jnp.float32)).astype(param_dtype)

    return {
        "n_head": n_head,
        "ln1_g": jnp.ones((1, C), param_dtype), "ln1_b": jnp.zeros((1, C), param_dtype),
        "w_qkv": w(ks[0], C, 3 * C), "b_qkv": b(ks[1], 3 * C),
        "w_proj": w(ks[2], C, C), "b_proj": b(ks[3], C),
        "ln2_g": jnp.ones((1, C), param_dtype), "ln2_b": jnp.zeros((1, C), param_dtype),
        "w1": w(ks[4], C, 4 * C), "b1": b(ks[5], 4 * C),
        "w2": w(ks[6], 4 * C, C), "b2": b(ks[7], C),
    }


def block_reference(x, params):
    """Plain-JAX reference matching the PyTorch Block forward (dropout = id)."""
    H = params["n_head"]
    B, T, C = x.shape
    D = C // H

    def ln(z, g, b):
        mu = jnp.mean(z, -1, keepdims=True)
        var = jnp.mean((z - mu) ** 2, -1, keepdims=True)
        return (z - mu) / jnp.sqrt(var + LN_EPS) * g + b

    h = ln(x, params["ln1_g"], params["ln1_b"])
    qkv = h @ params["w_qkv"] + params["b_qkv"]
    q, k, v = jnp.split(qkv, 3, axis=-1)

    def heads(z):
        return z.reshape(B, T, H, D).transpose(0, 2, 1, 3)

    q, k, v = heads(q), heads(k), heads(v)
    att = (q @ jnp.swapaxes(k, -1, -2)) / math.sqrt(D)
    mask = jnp.tril(jnp.ones((T, T), bool))
    att = jnp.where(mask, att, -jnp.inf)
    att = jax.nn.softmax(att, axis=-1)
    y = (att @ v).transpose(0, 2, 1, 3).reshape(B, T, C)
    x = x + y @ params["w_proj"] + params["b_proj"]
    h2 = ln(x, params["ln2_g"], params["ln2_b"])
    h2 = jax.nn.gelu(h2 @ params["w1"] + params["b1"], approximate=False)
    return x + h2 @ params["w2"] + params["b2"]


if __name__ == "__main__":
    B, T, C, H = 2, 8, 32, 4
    key = jax.random.PRNGKey(0)
    kp, kx = jax.random.split(key)
    params = init_block_params(kp, n_embd=C, n_head=H)
    x = jax.random.normal(kx, (B, T, C), jnp.float32)

    out = jax.block_until_ready(block_forward(x, params))
    assert out.shape == (B, T, C), out.shape
    assert out.dtype == jnp.float32

    ref = block_reference(x, params)
    err = float(jnp.max(jnp.abs(out - ref)))
    assert err < 2e-2, f"max abs err {err}"
    print("KERNEL_OK")
</pallas_src>

<mosaic_0001>
module attributes {stable_mosaic.version = 11 : i64} {
  func.func @qkv_kernel(%arg0: i32, %arg1: i32, %arg2: memref<1x8x32xf32, #tpu.memory_space<vmem>>, %arg3: memref<1x32xf32, #tpu.memory_space<vmem>>, %arg4: memref<1x32xf32, #tpu.memory_space<vmem>>, %arg5: memref<32x96xf32, #tpu.memory_space<vmem>>, %arg6: memref<1x96xf32, #tpu.memory_space<vmem>>, %arg7: memref<1x4x8x8xf32, #tpu.memory_space<vmem>>, %arg8: memref<1x4x8x8xf32, #tpu.memory_space<vmem>>, %arg9: memref<1x4x8x8xf32, #tpu.memory_space<vmem>>) attributes {dimension_semantics = [#tpu.dimension_semantics<parallel>, #tpu.dimension_semantics<parallel>], iteration_bounds = array<i64: 2, 1>, scalar_prefetch = 0 : i64, scratch_operands = 0 : i64, tpu.core_type = #tpu.core_type<tc>, window_params = [{transform_indices = @transform_0, window_bounds = array<i64: 1, 8, 32>}, {pipeline_mode = #tpu.pipeline_mode<synchronous>, transform_indices = @transform_1, window_bounds = array<i64: 1, 32>}, {pipeline_mode = #tpu.pipeline_mode<synchronous>, transform_indices = @transform_2, window_bounds = array<i64: 1, 32>}, {pipeline_mode = #tpu.pipeline_mode<synchronous>, transform_indices = @transform_3, window_bounds = array<i64: 32, 96>}, {pipeline_mode = #tpu.pipeline_mode<synchronous>, transform_indices = @transform_4, window_bounds = array<i64: 1, 96>}, {transform_indices = @transform_5, window_bounds = array<i64: 1, 4, 8, 8>}, {transform_indices = @transform_6, window_bounds = array<i64: 1, 4, 8, 8>}, {transform_indices = @transform_7, window_bounds = array<i64: 1, 4, 8, 8>}]} {
    %c0 = arith.constant 0 : index
    %c0_0 = arith.constant 0 : index
    %c0_1 = arith.constant 0 : index
    %0 = vector.load %arg2[%c0, %c0_0, %c0_1] : memref<1x8x32xf32, #tpu.memory_space<vmem>>, vector<1x8x32xf32>
    %1 = vector.shape_cast %0 : vector<1x8x32xf32> to vector<8x32xf32>
    %c0_2 = arith.constant 0 : index
    %c0_3 = arith.constant 0 : index
    %2 = vector.load %arg3[%c0_2, %c0_3] : memref<1x32xf32, #tpu.memory_space<vmem>>, vector<1x32xf32>
    %c0_4 = arith.constant 0 : index
    %c0_5 = arith.constant 0 : index
    %3 = vector.load %arg4[%c0_4, %c0_5] : memref<1x32xf32, #tpu.memory_space<vmem>>, vector<1x32xf32>
    %cst = arith.constant dense<0.000000e+00> : vector<8xf32>
    %4 = vector.multi_reduction <add>, %1, %cst [1] : vector<8x32xf32> to vector<8xf32>
    %5 = vector.shape_cast %4 : vector<8xf32> to vector<8x1xf32>
    %cst_6 = arith.constant 3.200000e+01 : f32
    %6 = vector.broadcast %cst_6 : f32 to vector<8x1xf32>
    %7 = arith.divf %5, %6 : vector<8x1xf32>
    %8 = vector.broadcast %7 : vector<8x1xf32> to vector<8x32xf32>
    %9 = arith.subf %1, %8 : vector<8x32xf32>
    %10 = arith.mulf %9, %9 : vector<8x32xf32>
    %cst_7 = arith.constant dense<0.000000e+00> : vector<8xf32>
    %11 = vector.multi_reduction <add>, %10, %cst_7 [1] : vector<8x32xf32> to vector<8xf32>
    %12 = vector.shape_cast %11 : vector<8xf32> to vector<8x1xf32>
    %cst_8 = arith.constant 3.200000e+01 : f32
    %13 = vector.broadcast %cst_8 : f32 to vector<8x1xf32>
    %14 = arith.divf %12, %13 : vector<8x1xf32>
    %15 = vector.broadcast %7 : vector<8x1xf32> to vector<8x32xf32>
    %16 = arith.subf %1, %15 : vector<8x32xf32>
    %cst_9 = arith.constant 9.99999974E-6 : f32
    %17 = vector.broadcast %cst_9 : f32 to vector<8x1xf32>
    %18 = arith.addf %14, %17 : vector<8x1xf32>
    %19 = math.rsqrt %18 : vector<8x1xf32>
    %20 = vector.broadcast %19 : vector<8x1xf32> to vector<8x32xf32>
    %21 = arith.mulf %16, %20 : vector<8x32xf32>
    %22 = vector.broadcast %2 : vector<1x32xf32> to vector<8x32xf32>
    %23 = arith.mulf %21, %22 : vector<8x32xf32>
    %24 = vector.broadcast %3 : vector<1x32xf32> to vector<8x32xf32>
    %25 = arith.addf %23, %24 : vector<8x32xf32>
    %c0_10 = arith.constant 0 : index
    %c0_11 = arith.constant 0 : index
    %26 = vector.load %arg5[%c0_10, %c0_11] : memref<32x96xf32, #tpu.memory_space<vmem>>, vector<32x96xf32>
    %cst_12 = arith.constant dense<0.000000e+00> : vector<8x96xf32>
    %27 = tpu.matmul %25, %26, %cst_12 {dimension_numbers = #tpu.dot_dimension_numbers<[1], [0], [0], [1], [0, 0, 1, 1], [], []>} : vector<8x32xf32>, vector<32x96xf32>, vector<8x96xf32> -> vector<8x96xf32>
    %c0_13 = arith.constant 0 : index
    %c0_14 = arith.constant 0 : index
    %28 = vector.load %arg6[%c0_13, %c0_14] : memref<1x96xf32, #tpu.memory_space<vmem>>, vector<1x96xf32>
    %29 = vector.broadcast %28 : vector<1x96xf32> to vector<8x96xf32>
    %30 = arith.addf %27, %29 : vector<8x96xf32>
    %31 = vector.extract_strided_slice %30 {offsets = [0, 0], sizes = [8, 8], strides = [1, 1]} : vector<8x96xf32> to vector<8x8xf32>
    %c0_15 = arith.constant 0 : index
    %c0_16 = arith.constant 0 : index
    %c0_17 = arith.constant 0 : index
    %c0_18 = arith.constant 0 : index
    %32 = vector.load %arg7[%c0_15, %c0_16, %c0_17, %c0_18] : memref<1x4x8x8xf32, #tpu.memory_space<vmem>>, vector<1x1x8x8xf32>
    %33 = vector.shape_cast %32 : vector<1x1x8x8xf32> to vector<8x8xf32>
    %34 = vector.shape_cast %31 : vector<8x8xf32> to vector<1x1x8x8xf32>
    tpu.vector_store %arg7[%c0_15, %c0_16, %c0_17, %c0_18], %34 {strides = array<i32>} : memref<1x4x8x8xf32, #tpu.memory_space<vmem>>, vector<1x1x8x8xf32>,
    %35 = vector.extract_strided_slice %30 {offsets = [0, 32], sizes = [8, 8], strides = [1, 1]} : vector<8x96xf32> to vector<8x8xf32>
    %c0_19 = arith.constant 0 : index
    %c0_20 = arith.constant 0 : index
    %c0_21 = arith.constant 0 : index
    %c0_22 = arith.constant 0 : index
    %36 = vector.load %arg8[%c0_19, %c0_20, %c0_21, %c0_22] : memref<1x4x8x8xf32, #tpu.memory_space<vmem>>, vector<1x1x8x8xf32>
    %37 = vector.shape_cast %36 : vector<1x1x8x8xf32> to vector<8x8xf32>
    %38 = vector.shape_cast %35 : vector<8x8xf32> to vector<1x1x8x8xf32>
    tpu.vector_store %arg8[%c0_19, %c0_20, %c0_21, %c0_22], %38 {strides = array<i32>} : memref<1x4x8x8xf32, #tpu.memory_space<vmem>>, vector<1x1x8x8xf32>,
    %39 = vector.extract_strided_slice %30 {offsets = [0, 64], sizes = [8, 8], strides = [1, 1]} : vector<8x96xf32> to vector<8x8xf32>
    %c0_23 = arith.constant 0 : index
    %c0_24 = arith.constant 0 : index
    %c0_25 = arith.constant 0 : index
    %c0_26 = arith.constant 0 : index
    %40 = vector.load %arg9[%c0_23, %c0_24, %c0_25, %c0_26] : memref<1x4x8x8xf32, #tpu.memory_space<vmem>>, vector<1x1x8x8xf32>
    %41 = vector.shape_cast %40 : vector<1x1x8x8xf32> to vector<8x8xf32>
    %42 = vector.shape_cast %39 : vector<8x8xf32> to vector<1x1x8x8xf32>
    tpu.vector_store %arg9[%c0_23, %c0_24, %c0_25, %c0_26], %42 {strides = array<i32>} : memref<1x4x8x8xf32, #tpu.memory_space<vmem>>, vector<1x1x8x8xf32>,
    %43 = vector.extract_strided_slice %30 {offsets = [0, 8], sizes = [8, 8], strides = [1, 1]} : vector<8x96xf32> to vector<8x8xf32>
    %c0_27 = arith.constant 0 : index
    %c1 = arith.constant 1 : index
    %c0_28 = arith.constant 0 : index
    %c0_29 = arith.constant 0 : index
    %44 = vector.load %arg7[%c0_27, %c1, %c0_28, %c0_29] : memref<1x4x8x8xf32, #tpu.memory_space<vmem>>, vector<1x1x8x8xf32>
    %45 = vector.shape_cast %44 : vector<1x1x8x8xf32> to vector<8x8xf32>
    %46 = vector.shape_cast %43 : vector<8x8xf32> to vector<1x1x8x8xf32>
    tpu.vector_store %arg7[%c0_27, %c1, %c0_28, %c0_29], %46 {strides = array<i32>} : memref<1x4x8x8xf32, #tpu.memory_space<vmem>>, vector<1x1x8x8xf32>,
    %47 = vector.extract_strided_slice %30 {offsets = [0, 40], sizes = [8, 8], strides = [1, 1]} : vector<8x96xf32> to vector<8x8xf32>
    %c0_30 = arith.constant 0 : index
    %c1_31 = arith.constant 1 : index
    %c0_32 = arith.constant 0 : index
    %c0_33 = arith.constant 0 : index
    %48 = vector.load %arg8[%c0_30, %c1_31, %c0_32, %c0_33] : memref<1x4x8x8xf32, #tpu.memory_space<vmem>>, vector<1x1x8x8xf32>
    %49 = vector.shape_cast %48 : vector<1x1x8x8xf32> to vector<8x8xf32>
    %50 = vector.shape_cast %47 : vector<8x8xf32> to vector<1x1x8x8xf32>
    tpu.vector_store %arg8[%c0_30, %c1_31, %c0_32, %c0_33], %50 {strides = array<i32>} : memref<1x4x8x8xf32, #tpu.memory_space<vmem>>, vector<1x1x8x8xf32>,
    %51 = vector.extract_strided_slice %30 {offsets = [0, 72], sizes = [8, 8], strides = [1, 1]} : vector<8x96xf32> to vector<8x8xf32>
    %c0_34 = arith.constant 0 : index
    %c1_35 = arith.constant 1 : index
    %c0_36 = arith.constant 0 : index
    %c0_37 = arith.constant 0 : index
    %52 = vector.load %arg9[%c0_34, %c1_35, %c0_36, %c0_37] : memref<1x4x8x8xf32, #tpu.memory_space<vmem>>, vector<1x1x8x8xf32>
    %53 = vector.shape_cast %52 : vector<1x1x8x8xf32> to vector<8x8xf32>
    %54 = vector.shape_cast %51 : vector<8x8xf32> to vector<1x1x8x8xf32>
    tpu.vector_store %arg9[%c0_34, %c1_35, %c0_36, %c0_37], %54 {strides = array<i32>} : memref<1x4x8x8xf32, #tpu.memory_space<vmem>>, vector<1x1x8x8xf32>,
    %55 = vector.extract_strided_slice %30 {offsets = [0, 16], sizes = [8, 8], strides = [1, 1]} : vector<8x96xf32> to vector<8x8xf32>
    %c0_38 = arith.constant 0 : index
    %c2 = arith.constant 2 : index
    %c0_39 = arith.constant 0 : index
    %c0_40 = arith.constant 0 : index
    %56 = vector.load %arg7[%c0_38, %c2, %c0_39, %c0_40] : memref<1x4x8x8xf32, #tpu.memory_space<vmem>>, vector<1x1x8x8xf32>
    %57 = vector.shape_cast %56 : vector<1x1x8x8xf32> to vector<8x8xf32>
    %58 = vector.shape_cast %55 : vector<8x8xf32> to vector<1x1x8x8xf32>
    tpu.vector_store %arg7[%c0_38, %c2, %c0_39, %c0_40], %58 {strides = array<i32>} : memref<1x4x8x8xf32, #tpu.memory_space<vmem>>, vector<1x1x8x8xf32>,
    %59 = vector.extract_strided_slice %30 {offsets = [0, 48], sizes = [8, 8], strides = [1, 1]} : vector<8x96xf32> to vector<8x8xf32>
    %c0_41 = arith.constant 0 : index
    %c2_42 = arith.constant 2 : index
    %c0_43 = arith.constant 0 : index
    %c0_44 = arith.constant 0 : index
    %60 = vector.load %arg8[%c0_41, %c2_42, %c0_43, %c0_44] : memref<1x4x8x8xf32, #tpu.memory_space<vmem>>, vector<1x1x8x8xf32>
    %61 = vector.shape_cast %60 : vector<1x1x8x8xf32> to vector<8x8xf32>
    %62 = vector.shape_cast %59 : vector<8x8xf32> to vector<1x1x8x8xf32>
    tpu.vector_store %arg8[%c0_41, %c2_42, %c0_43, %c0_44], %62 {strides = array<i32>} : memref<1x4x8x8xf32, #tpu.memory_space<vmem>>, vector<1x1x8x8xf32>,
    %63 = vector.extract_strided_slice %30 {offsets = [0, 80], sizes = [8, 8], strides = [1, 1]} : vector<8x96xf32> to vector<8x8xf32>
    %c0_45 = arith.constant 0 : index
    %c2_46 = arith.constant 2 : index
    %c0_47 = arith.constant 0 : index
    %c0_48 = arith.constant 0 : index
    %64 = vector.load %arg9[%c0_45, %c2_46, %c0_47, %c0_48] : memref<1x4x8x8xf32, #tpu.memory_space<vmem>>, vector<1x1x8x8xf32>
    %65 = vector.shape_cast %64 : vector<1x1x8x8xf32> to vector<8x8xf32>
    %66 = vector.shape_cast %63 : vector<8x8xf32> to vector<1x1x8x8xf32>
    tpu.vector_store %arg9[%c0_45, %c2_46, %c0_47, %c0_48], %66 {strides = array<i32>} : memref<1x4x8x8xf32, #tpu.memory_space<vmem>>, vector<1x1x8x8xf32>,
    %67 = vector.extract_strided_slice %30 {offsets = [0, 24], sizes = [8, 8], strides = [1, 1]} : vector<8x96xf32> to vector<8x8xf32>
    %c0_49 = arith.constant 0 : index
    %c3 = arith.constant 3 : index
    %c0_50 = arith.constant 0 : index
    %c0_51 = arith.constant 0 : index
    %68 = vector.load %arg7[%c0_49, %c3, %c0_50, %c0_51] : memref<1x4x8x8xf32, #tpu.memory_space<vmem>>, vector<1x1x8x8xf32>
    %69 = vector.shape_cast %68 : vector<1x1x8x8xf32> to vector<8x8xf32>
    %70 = vector.shape_cast %67 : vector<8x8xf32> to vector<1x1x8x8xf32>
    tpu.vector_store %arg7[%c0_49, %c3, %c0_50, %c0_51], %70 {strides = array<i32>} : memref<1x4x8x8xf32, #tpu.memory_space<vmem>>, vector<1x1x8x8xf32>,
    %71 = vector.extract_strided_slice %30 {offsets = [0, 56], sizes = [8, 8], strides = [1, 1]} : vector<8x96xf32> to vector<8x8xf32>
    %c0_52 = arith.constant 0 : index
    %c3_53 = arith.constant 3 : index
    %c0_54 = arith.constant 0 : index
    %c0_55 = arith.constant 0 : index
    %72 = vector.load %arg8[%c0_52, %c3_53, %c0_54, %c0_55] : memref<1x4x8x8xf32, #tpu.memory_space<vmem>>, vector<1x1x8x8xf32>
    %73 = vector.shape_cast %72 : vector<1x1x8x8xf32> to vector<8x8xf32>
    %74 = vector.shape_cast %71 : vector<8x8xf32> to vector<1x1x8x8xf32>
    tpu.vector_store %arg8[%c0_52, %c3_53, %c0_54, %c0_55], %74 {strides = array<i32>} : memref<1x4x8x8xf32, #tpu.memory_space<vmem>>, vector<1x1x8x8xf32>,
    %75 = vector.extract_strided_slice %30 {offsets = [0, 88], sizes = [8, 8], strides = [1, 1]} : vector<8x96xf32> to vector<8x8xf32>
    %c0_56 = arith.constant 0 : index
    %c3_57 = arith.constant 3 : index
    %c0_58 = arith.constant 0 : index
    %c0_59 = arith.constant 0 : index
    %76 = vector.load %arg9[%c0_56, %c3_57, %c0_58, %c0_59] : memref<1x4x8x8xf32, #tpu.memory_space<vmem>>, vector<1x1x8x8xf32>
    %77 = vector.shape_cast %76 : vector<1x1x8x8xf32> to vector<8x8xf32>
    %78 = vector.shape_cast %75 : vector<8x8xf32> to vector<1x1x8x8xf32>
    tpu.vector_store %arg9[%c0_56, %c3_57, %c0_58, %c0_59], %78 {strides = array<i32>} : memref<1x4x8x8xf32, #tpu.memory_space<vmem>>, vector<1x1x8x8xf32>,
    return
  }
  func.func @transform_0(%arg0: i32, %arg1: i32) -> (i32, i32, i32) {
    %c0_i32 = arith.constant 0 : i32
    %c0_i32_0 = arith.constant 0 : i32
    return %arg0, %arg1, %c0_i32 : i32, i32, i32
  }
  func.func @transform_1(%arg0: i32, %arg1: i32) -> (i32, i32) {
    %c0_i32 = arith.constant 0 : i32
    %c0_i32_0 = arith.constant 0 : i32
    %c0_i32_1 = arith.constant 0 : i32
    return %c0_i32, %c0_i32_0 : i32, i32
  }
  func.func @transform_2(%arg0: i32, %arg1: i32) -> (i32, i32) {
    %c0_i32 = arith.constant 0 : i32
    %c0_i32_0 = arith.constant 0 : i32
    %c0_i32_1 = arith.constant 0 : i32
    return %c0_i32, %c0_i32_0 : i32, i32
  }
  func.func @transform_3(%arg0: i32, %arg1: i32) -> (i32, i32) {
    %c0_i32 = arith.constant 0 : i32
    %c0_i32_0 = arith.constant 0 : i32
    %c0_i32_1 = arith.constant 0 : i32
    return %c0_i32, %c0_i32_0 : i32, i32
  }
  func.func @transform_4(%arg0: i32, %arg1: i32) -> (i32, i32) {
    %c0_i32 = arith.constant 0 : i32
    %c0_i32_0 = arith.constant 0 : i32
    %c0_i32_1 = arith.constant 0 : i32
    return %c0_i32, %c0_i32_0 : i32, i32
  }
  func.func @transform_5(%arg0: i32, %arg1: i32) -> (i32, i32, i32, i32) {
    %c0_i32 = arith.constant 0 : i32
    %c0_i32_0 = arith.constant 0 : i32
    %c0_i32_1 = arith.constant 0 : i32
    return %arg0, %c0_i32, %arg1, %c0_i32_0 : i32, i32, i32, i32
  }
  func.func @transform_6(%arg0: i32, %arg1: i32) -> (i32, i32, i32, i32) {
    %c0_i32 = arith.constant 0 : i32
    %c0_i32_0 = arith.constant 0 : i32
    %c0_i32_1 = arith.constant 0 : i32
    return %arg0, %c0_i32, %arg1, %c0_i32_0 : i32, i32, i32, i32
  }
  func.func @transform_7(%arg0: i32, %arg1: i32) -> (i32, i32, i32, i32) {
    %c0_i32 = arith.constant 0 : i32
    %c0_i32_0 = arith.constant 0 : i32
    %c0_i32_1 = arith.constant 0 : i32
    return %arg0, %c0_i32, %arg1, %c0_i32_0 : i32, i32, i32, i32
  }
}

</mosaic_0001>

<bundles_post_ra>
// kernel: tpu_custom_call.1
= control target key start
LH: loop header
LB: loop body
LE: loop exit
PB: predicated region body
PF: predicated region fallthrough
CT: control target
= control target key end

     0   :  { %s1507_s0 = inlined_call_operand.hbm [shape: f32[2,8,32], index: 0, kind: input, shape index: {}]   ;;  %s1508_s1 = inlined_call_operand.vmem [shape: f32[1,32], index: 1, kind: input, shape index: {}]   ;;  %s1509_s2 = inlined_call_operand.vmem [shape: f32[1,32], index: 2, kind: input, shape index: {}]   ;;  %s1510_s3 = inlined_call_operand.hbm [shape: f32[32,96], index: 3, kind: input, shape index: {}]   ;;  %s1511_s4 = inlined_call_operand.vmem [shape: f32[1,96], index: 4, kind: input, shape index: {}]   ;;  %s1512_s5 = inlined_call_operand.hbm [shape: f32[2,4,8,8], index: 5, kind: output, shape index: {0}]   ;;  %s1513_s6 = inlined_call_operand.hbm [shape: f32[2,4,8,8], index: 6, kind: output, shape index: {1}]   ;;  %s1514_s7 = inlined_call_operand.hbm [shape: f32[2,4,8,8], index: 7, kind: output, shape index: {2}]  }
   0x1   :  { %1520 = sst [smem:[#allocation16_spill]] %s1510_s3 }
   0x2   :  { %13 = vsyncpa [#allocation3], 0 }
   0x3   :  { %15 = vsyncpa [#allocation3 + $0x1], 0 }
   0x4   :  { %16 = vsyncpa [#allocation6], 0 }
   0x5   :  { %17 = vsyncpa [#allocation4], 0 }
   0x6   :  { %19 = vsyncpa [#allocation4 + $0x1], 0 }
   0x7   :  { %20 = vsyncpa [#allocation9], 0 }
   0x8   :  { %22 = vsyncpa [#allocation9 + $0x1], 0  ;;  %s1172_s24 = smov 0   ;;  %s1174_s25 = smov 0  }
   0x9   :  { %s1176_s26 = smov 0   ;;  %s1178_s27 = smov 0  }
   0xa   :  { %s1180_s28 = smov 0   ;;  %s1182_s29 = smov 0  }
   0xb LB: > { %s1203_s30 = sadd.s32 4294967295, %s1107_s29   ;;  %s1518_s8 = sadd.s32 4294967294, %s1107_s29   ;;  %s1107_s29 = sphi %s1182_s29, %s28_s29   ;;  %s1103_s28 = sphi %s1180_s28, %s1544_s28   ;;  %s1099_s27 = sphi %s1178_s27, %s1543_s27   ;;  %s1095_s26 = sphi %s1176_s26, %s1542_s26   ;;  %s1091_s25 = sphi %s1174_s25, %s1541_s25   ;;  %s1087_s24 = sphi %s1172_s24, %s1540_s24  }
   0xc   : > { %p62_p0 = scmp.ne.s32.totalorder %s1091_s25, %s1087_s24  ;;  %p1515_p1 = scmp.eq.s32.totalorder %s1203_s30, 0 }
   0xd   : > { %p178_p3 = scmp.eq.s32.totalorder %s1518_s8, 1  ;;  %p740_p5 = scmp.ge.s32.totalorder %s1107_s29, 1 }
   0xe   : > { %p1214_p4 = por %p1515_p1, %p62_p0  ;;  %p241_p7 = scmp.lt.s32.totalorder %s1107_s29, 3 }
   0xf   : > { %p1219_p6 = por %p178_p3, %p62_p0  ;;  %s1109_s12 = smov [#allocation5]  }
  0x10   : > { %s1521_s9 = scalar_select %p1214_p4, 1, 0 }
  0x11   : > { %s1522_s10 = scalar_select %p1219_p6, 1, 0 }
  0x12   : > { %p1224_p8 = pnand %p740_p5, %p241_p7  ;;  %s259_s13 = sshll.u32 %s1109_s12, 4  ;;  %s260_s13 = int_to_ptr.vmem [resolvable:$true] %s259_s13 }
  0x13   : > { %s40_s15 = sadd.s32 1, %s1103_s28  ;;  %s1525_s3 = sld [smem:[#allocation16_spill]] }
  0x14   : > { %s1523_s11 = scalar_select %p1224_p8, 1, 0 }
  0x15   : > { %p812_p9 = pneg %p1224_p8 }
  0x17   : > { %p1233_p11 = pnand %p812_p9, %p1515_p1 }
  0x19   : > { %s903_s18 = scalar_lea.hbm %s1525_s3, 512  ;;  %p905_p13 = pneg %p1233_p11 }
  0x1a   : > { %p904_p12 = scmp.ne.s32.totalorder %s1525_s3, %s903_s18  ;;  %p910_p5 = scmp.lt.u32.totalorder %s903_s18, %s1525_s3 }
  0x1c   : > { %p906_p0 = pnand %p905_p13, %p904_p12 }
  0x1e   : > { %p907_p3 = pneg %p906_p0 }
  0x20   : > { %p912_p7 = pnand %p910_p5, %p907_p3 }
  0x22   : > { %915 = shalt.err (!%p912_p7)
}
  0x23   : > { %s916_s23 = scalar_lea.vmem %s260_s13, 512  ;;  %p924_p2 = scmp.lt.s32.totalorder %s260_s13, %s260_s13 }
  0x24   : > { %p917_p9 = scmp.ne.s32.totalorder %s260_s13, %s916_s23  ;;  %p925_p6 = scmp.lt.s32.totalorder %s916_s23, %s916_s23 }
  0x26   : > { %p919_p10 = pnand %p917_p9, %p905_p13  ;;  %p926_p4 = por %p925_p6, %p924_p2 }
  0x28   : > { %p920_p1 = pneg %p919_p10 }
  0x2a   : > { %p927_p8 = pnand %p926_p4, %p920_p1 }
  0x2c   : > { %930 = shalt.err (!%p927_p8)
}
  0x2d   : > { %s1110_s12 = smov 128   ;;  %s1111_s16 = smov 8  }
  0x2e   : > { %815 = dma.hbm_to_vmem [thread:$0]  (!%p1233_p11), %s1525_s3, 512, %s260_s13, [#allocation6], %s1110_s12, %s1110_s12, %s1111_s16  }
  0x2f   : > { %p42_p1 = scmp.ge.s32.totalorder %s40_s15, 2  ;;  %s49_s19 = sadd.s32 1, %s1095_s26 }
  0x30   : > { %p56_p2 = scmp.ne.s32.totalorder %s1095_s26, %s1091_s25  ;;  %p57_p4 = scmp.eq.s32.totalorder %s1107_s29, 0 }
  0x31   : > { %s1546_s15 = smov (%p42_p1, %s40_s15), 0  ;;  %p1528_p8 = scmp.eq.s32.totalorder %s1203_s30, 1 }
  0x32   : > { %1526 = sst [smem:[#allocation15_spill]] %s1546_s15  ;;  %p1260_p6 = por %p57_p4, %p56_p2 }
  0x33   : > { %p1266_p10 = por %p1528_p8, %p56_p2  ;;  %s44_s14 = ssub.s32 %s1103_s28, %s1546_s15 }
  0x34   : > { %p831_p12 = scmp.lt.s32.totalorder %s1107_s29, 2  ;;  %p47_p11 = scmp.eq.s32.totalorder %s44_s14, 0 }
  0x35   : > { %s276_s13 = sand.u32 1, %s1095_s26   ;;  %s744_s12 = sshll.u32 %s1103_s28, 7 }
  0x36   : > { %s743_s22 = sshll.u32 %s276_s13, 3  ;;  %s1281_s18 = scalar_lea.hbm %s1507_s0, %s744_s12 }
  0x37   : > { %s1275_s23 = scalar_select %p47_p11, %s1095_s26, %s49_s19  }
  0x38   : > { %s280_s8 = scalar_lea.vmem [#allocation2], %s743_s22  ;;  %p1287_p13 = pnand %p831_p12, %p1260_p6 }
  0x39   : > { %s288_s3 = sshll.u32 %s280_s8, 4  ;;  %s277_s19 = scalar_lea.sflag [#allocation3], %s276_s13  ;;  %s1283_s3 = int_to_ptr.vmem [resolvable:$true] %s288_s3 }
  0x3a   : > { %s931_s15 = scalar_lea.hbm %s1281_s18, 128  ;;  %p933_p3 = pneg %p1287_p13 }
  0x3b   : > { %p932_p0 = scmp.ne.s32.totalorder %s1281_s18, %s931_s15  ;;  %s936_s12 = scalar_lea.hbm %s1507_s0, 256 }
  0x3c   : > { %p937_p9 = scmp.lt.u32.totalorder %s1281_s18, %s1507_s0  ;;  %p938_p1 = scmp.lt.u32.totalorder %s936_s12, %s931_s15 }
  0x3d   : > { %p934_p5 = pnand %p933_p3, %p932_p0  ;;  %p940_p4 = scmp.lt.u32.totalorder %s931_s15, %s1281_s18 }
  0x3e   : > { %p939_p2 = por %p938_p1, %p937_p9 }
  0x3f   : > { %p935_p7 = pneg %p934_p5 }
  0x40   : > { %p941_p6 = por %p940_p4, %p939_p2 }
  0x42   : > { %p942_p8 = pnand %p941_p6, %p935_p7 }
  0x44   : > { %945 = shalt.err (!%p942_p8)
}
  0x45   : > { %s946_s13 = scalar_lea.vmem %s1283_s3, 128  ;;  %s1112_s17 = smov [#allocation2]  }
  0x46   : > { %p947_p12 = scmp.ne.s32.totalorder %s1283_s3, %s946_s13  ;;  %s951_s22 = sshll.u32 %s1112_s17, 4  ;;  %s952_s22 = int_to_ptr.vmem [resolvable:$false] %s951_s22 }
  0x47   : > { %s953_s8 = scalar_lea.vmem %s952_s22, 256  ;;  %p954_p5 = scmp.lt.s32.totalorder %s1283_s3, %s952_s22 }
  0x48   : > { %p949_p11 = pnand %p947_p12, %p933_p3  ;;  %p955_p9 = scmp.lt.s32.totalorder %s953_s8, %s946_s13 }
  0x4a   : > { %p950_p0 = pneg %p949_p11  ;;  %p956_p1 = por %p955_p9, %p954_p5 }
  0x4c   : > { %p957_p2 = pnand %p956_p1, %p950_p0 }
  0x4e   : > { %960 = shalt.err (!%p957_p2)
}
  0x4f   : > { %819 = dma.hbm_to_vmem [thread:$0]  (!%p1287_p13), %s1281_s18, 128, %s1283_s3, %s277_s19  }
  0x50   : > { %p1531_p7 = scmp.ne.s32.totalorder %s1523_s11, 0 }
  0x51   : > { %s1319_s15 = sand.u32 (!%p1531_p7), 1, %s1091_s25   ;;  %p1532_p3 = scmp.ne.s32.totalorder (!%p1531_p7), %s1521_s9, 0 }
  0x52   : > { %297 = sbr.rel (%p1531_p7) target bundleno = 808 (0x328), region = 40  ;;  %s746_s12 = sshll.u32 (!%p1531_p7), %s1319_s15, 3 }
  0x53   : > { %s300_s20 = scalar_lea.sflag (!%p1531_p7), [#allocation3], %s1319_s15  ;;  %s303_s16 = scalar_lea.vmem (!%p1531_p7), [#allocation2], %s746_s12 }
  0x59   : > { %1070 = dma.done.wait (%p1532_p3), %s300_s20, 128  }
  0x5a   : > { %1072 = vsyncadd (%p1532_p3), %s300_s20, 4294967168  ;;  %p1533_p4 = scmp.eq.s32.totalorder %s1203_s30, 0 }
  0x5c   : > { %1074 = dma.done.wait (%p1533_p4), [#allocation6], 512   ;;  %p1534_p13 = pmov %p1533_p4 }
  0x5d   : > { %vm351_vm0 = vcmask 261120   ;;  %v348_v0 = vld [vmem:[%s303_s16] sm:$0xff]  ;;  %v380_v7 = vld [vmem:[#allocation5] sm:$0xff]  ;;  %v381_v8 = vld [vmem:[#allocation5 + $0x8] sm:$0xff]  ;;  %v1113_v10 = vmov 0.0|0.0   ;;  %vm1114_vm1 = vmmov 0  }
  0x5e   : > { %1076 = vsyncadd (%p1534_p13), [#allocation6], 4294966784  ;;  %v352_v1 = vsel %vm351_vm0, %v348_v0, 0.0  ;;  %v382_v9 = vld [vmem:[#allocation5 + $0x10] sm:$0xff]  ;;  %794 = vmatprep.subr.bf16.mxu0 %v1113_v10  ;;  %v795_v11 = vpack.c.bf16 %v381_v8, %v380_v7  ;;  %v383_v12 = vld [vmem:[#allocation5 + $0x18] sm:$0xff]  ;;  %v1115_v13 = vmov 0.0  }
  0x5f   : > { %353 = vadd.xlane.f32.xlu0 %v352_v1  ;;  %791 = vmatprep.mubr.msk.f32.mxu0 %vm1114_vm1, %v1115_v13  ;;  %v798_v14 = vpack.c.bf16 %v383_v12, %v382_v9  ;;  %v751_v19 = vld [vmem:[%s1508_s1] ss:$0 sm:$0xff]  ;;  %s1341_s14 = sshll.u32 %s1319_s15, 5  ;;  %vm464_vm2 = vcmask 64512   ;;  %s1116_s17 = smov 80  }
  0x60   : > { %796 = vmatpush3.bf16.msra.mxu0 %v795_v11  ;;  %v752_v21 = vld [vmem:[%s1509_s2] ss:$0 sm:$0xff]  ;;  %s1117_s22 = smov 96   ;;  %s1347_s8 = scalar_lea.vmem [#allocation7], %s1341_s14 }
  0x61   : > { %797 = vmatprep.subr.bf16.mxu0 %v1113_v10  ;;  %v753_v24 = vld [vmem:[%s1511_s4] ss:$0 sm:$0xff]  ;;  %s1118_s12 = smov 104   ;;  %s1119_s20 = smov 88  }
  0x62   : > { %s1120_s16 = smov 72   ;;  %s1121_s3 = smov 64  }
  0x63   : > { %s1122_s9 = smov 120   ;;  %s1123_s11 = smov 56  }
  0x64   : > { %799 = vmatpush3.bf16.msra.mxu0 %v798_v14  ;;  %s1124_s18 = smov 112   ;;  %s1125_s19 = smov 48  }
  0x65   : > { %s1126_s13 = smov 40  }
  0xec   : > { %v354_v2 = vpop.xlane.xlu0 %353 }
  0xed   : > { %v356_v3 = vmul.f32 0.03125, %v354_v2 }
  0xef   : > { %v357_v4 = vsub.f32 %v348_v0, %v356_v3 }
  0xf1   : > { %v358_v5 = vmul.f32 %v357_v4, %v357_v4 }
  0xf3   : > { %v359_v6 = vsel %vm351_vm0, %v358_v5, 0.0 }
  0xf4   : > { %360 = vadd.xlane.f32.xlu0 %v359_v6 }
 0x181   : > { %v361_v15 = vpop.xlane.xlu0 %360 }
 0x182   : > { %v362_v16 = vmul.f32 0.03125, %v361_v15 }
 0x184   : > { %v363_v17 = vadd.f32 1e-05, %v362_v16 }
 0x186   : > { %901 = vrsqrt.f32 %v363_v17 }
 0x190   : > { %v902_v18 = vpop.eup %901 }
 0x191   : > { %v365_v20 = vmul.f32 %v902_v18, %v357_v4 }
 0x193   : > { %v372_v22 = vmul.f32 %v751_v19, %v365_v20 }
 0x195   : > { %v379_v23 = vadd.f32 %v752_v21, %v372_v22 }
 0x197   : > { %792 = vmatmul.mubr.msk.f32.vlgmr.msra.gmra.mrb[0].mxu0 %vm351_vm0, %v379_v23 }
 0x26a   : > { %v460_v25 = vpop.f32.mrb[0].mxu0 }
 0x26b   : > { %v461_v26 = vadd.f32 %v753_v24, %v460_v25  ;;  %v793_v27 = vpop.f32.mrb[1].mxu0 }
 0x26d   : > { %495 = vrot.lane.b32.xlu0 %v461_v26, %s1116_s17  ;;  %467 = vrot.lane.b32.xlu1 %v461_v26, %s1117_s22  ;;  %465 = vst.msk [vmem:[%s1347_s8] sm:$0xff] %vm464_vm2, %v461_v26  ;;  %s340_s17 = scalar_lea.vmem [#allocation8], %s1341_s14 }
 0x26e   : > { %s562_s22 = sshll.u32 %s340_s17, 4  ;;  %s1358_s22 = int_to_ptr.vmem [resolvable:$true] %s562_s22 }
 0x271   : > { %505 = vrot.lane.b32.xlu0 %v461_v26, %s1118_s12  ;;  %480 = vrot.lane.b32.xlu1 %v461_v26, %s1119_s20  ;;  %s525_s12 = sand.u32 1, %s1203_s30   ;;  %s1356_s20 = sshll.u32 %s1099_s27, 9 }
 0x272   : > { %s1370_s27 = scalar_lea.sflag [#allocation9], %s525_s12  ;;  %s961_s30 = scalar_lea.vmem %s1358_s22, 512 }
 0x273   : > { %p962_p6 = scmp.ne.s32.totalorder %s1358_s22, %s961_s30 }
 0x275   : > { %510 = vrot.lane.b32.xlu1 %v461_v26, %s1120_s16  ;;  %p963_p8 = pnand %p962_p6, %p1266_p10 }
 0x277   : > { %p964_p12 = pneg %p963_p8 }
 0x279   : > { %471 = vrot.lane.b32.xlu1 %v461_v26, %s1121_s3 }
 0x27d   : > { %475 = vrot.lane.b32.xlu1 %v461_v26, %s1122_s9  ;;  %s1367_s9 = scalar_lea.hbm %s1513_s6, %s1356_s20 }
 0x281   : > { %485 = vrot.lane.b32.xlu1 %v461_v26, %s1123_s11  ;;  %s1127_s11 = smov [#allocation8]  }
 0x285   : > { %490 = vrot.lane.b32.xlu1 %v461_v26, %s1124_s18  ;;  %s965_s18 = sshll.u32 %s1127_s11, 4  ;;  %s966_s18 = int_to_ptr.vmem [resolvable:$false] %s965_s18 }
 0x286   : > { %p968_p11 = scmp.lt.s32.totalorder %s1358_s22, %s966_s18 }
 0x289   : > { %500 = vrot.lane.b32.xlu1 %v461_v26, %s1125_s19  ;;  %s967_s19 = scalar_lea.vmem %s966_s18, 1024 }
 0x28a   : > { %p969_p0 = scmp.lt.s32.totalorder %s967_s19, %s961_s30 }
 0x28c   : > { %p970_p5 = por %p969_p0, %p968_p11 }
 0x28d   : > { %515 = vrot.lane.b32.xlu1 %v461_v26, %s1126_s13 }
 0x28e   : > { %p971_p9 = pnand %p970_p5, %p964_p12 }
 0x2df   : > { %v496_v28 = vpop.permute.xlu0 %495  ;;  %v468_v29 = vpop.permute.xlu1 %467 }
 0x2e0   : > { %759 = vst.msk [vmem:[%s340_s17 + $0x10] sm:$0xff] %vm464_vm2, %v496_v28  ;;  %470 = vst.msk [vmem:[%s340_s17] sm:$0xff] %vm464_vm2, %v468_v29 }
 0x2e3   : > { %v506_v30 = vpop.permute.xlu0 %505  ;;  %v481_v31 = vpop.permute.xlu1 %480 }
 0x2e4   : > { %761 = vst.msk [vmem:[%s1347_s8 + $0x18] sm:$0xff] %vm464_vm2, %v506_v30  ;;  %756 = vst.msk [vmem:[%s340_s17 + $0x8] sm:$0xff] %vm464_vm2, %v481_v31 }
 0x2e7   : > { %v511_v32 = vpop.permute.xlu1 %510 }
 0x2e8   : > { %762 = vst.msk [vmem:[%s340_s17 + $0x18] sm:$0xff] %vm464_vm2, %v511_v32 }
 0x2e9   : > { %974 = shalt.err (!%p971_p9)
}
 0x2ea   : > { %s975_s13 = scalar_lea.hbm %s1367_s9, 512  ;;  %s979_s16 = scalar_lea.hbm %s1513_s6, 1024 }
 0x2eb   : > { %p976_p1 = scmp.ne.s32.totalorder %s1367_s9, %s975_s13  ;;  %p980_p3 = scmp.lt.u32.totalorder %s1367_s9, %s1513_s6 }
 0x2ec   : > { %p981_p4 = scmp.lt.u32.totalorder %s979_s16, %s975_s13  ;;  %p983_p6 = scmp.lt.u32.totalorder %s975_s13, %s1367_s9 }
 0x2ed   : > { %p977_p2 = pnand %p976_p1, %p1266_p10 }
 0x2ee   : > { %p982_p13 = por %p981_p4, %p980_p3 }
 0x2ef   : > { %p978_p7 = pneg %p977_p2 }
 0x2f0   : > { %p984_p8 = por %p983_p6, %p982_p13 }
 0x2f2   : > { %p985_p12 = pnand %p984_p8, %p978_p7 }
 0x2f4   : > { %988 = shalt.err (!%p985_p12)
}
 0x2f5   : > { %s1128_s30 = smov 128   ;;  %s1129_s18 = smov 8   ;;  %v472_v33 = vpop.permute.xlu1 %471 }
 0x2f6   : > { %807 = dma.vmem_to_hbm [thread:$0]  (%p1266_p10), %s1358_s22, 512, %s1367_s9, %s1370_s27, %s1128_s30, %s1128_s30, %s1129_s18  }
 0x2f7   : > { %s1398_s19 = scalar_lea.vmem [#allocation10], %s1341_s14  ;;  %s545_s13 = sshll.u32 %s1347_s8, 4  ;;  %s1407_s13 = int_to_ptr.vmem [resolvable:$true] %s545_s13 }
 0x2f8   : > { %474 = vst.msk [vmem:[%s1398_s19] sm:$0xff] %vm464_vm2, %v472_v33  ;;  %s1413_s14 = scalar_lea.hbm %s1512_s5, %s1356_s20  ;;  %s989_s9 = scalar_lea.vmem %s1407_s13, 512 }
 0x2f9   : > { %v476_v34 = vpop.permute.xlu1 %475  ;;  %p990_p11 = scmp.ne.s32.totalorder %s1407_s13, %s989_s9  ;;  %s1130_s16 = smov [#allocation7]  }
 0x2fa   : > { %755 = vst.msk [vmem:[%s1347_s8 + $0x8] sm:$0xff] %vm464_vm2, %v476_v34  ;;  %s993_s3 = sshll.u32 %s1130_s16, 4  ;;  %s994_s3 = int_to_ptr.vmem [resolvable:$false] %s993_s3 }
 0x2fb   : > { %p991_p0 = pnand %p990_p11, %p1266_p10  ;;  %s995_s11 = scalar_lea.vmem %s994_s3, 1024 }
 0x2fc   : > { %p996_p9 = scmp.lt.s32.totalorder %s1407_s13, %s994_s3  ;;  %p997_p1 = scmp.lt.s32.totalorder %s995_s11, %s989_s9 }
 0x2fd   : > { %v486_v35 = vpop.permute.xlu1 %485  ;;  %p992_p5 = pneg %p991_p0 }
 0x2fe   : > { %757 = vst.msk [vmem:[%s1398_s19 + $0x8] sm:$0xff] %vm464_vm2, %v486_v35  ;;  %p998_p2 = por %p997_p1, %p996_p9 }
 0x300   : > { %p999_p7 = pnand %p998_p2, %p992_p5 }
 0x301   : > { %v491_v36 = vpop.permute.xlu1 %490 }
 0x302   : > { %758 = vst.msk [vmem:[%s1347_s8 + $0x10] sm:$0xff] %vm464_vm2, %v491_v36 }
 0x303   : > { %1002 = shalt.err (!%p999_p7)
}
 0x304   : > { %s1003_s8 = scalar_lea.hbm %s1413_s14, 512  ;;  %s1007_s16 = scalar_lea.hbm %s1512_s5, 1024 }
 0x305   : > { %p1004_p3 = scmp.ne.s32.totalorder %s1413_s14, %s1003_s8  ;;  %p1008_p6 = scmp.lt.u32.totalorder %s1413_s14, %s1512_s5 }
 0x306   : > { %p1009_p8 = scmp.lt.u32.totalorder %s1007_s16, %s1003_s8  ;;  %p1011_p11 = scmp.lt.u32.totalorder %s1003_s8, %s1413_s14 }
 0x307   : > { %p1005_p4 = pnand %p1004_p3, %p1266_p10 }
 0x308   : > { %p1010_p12 = por %p1009_p8, %p1008_p6 }
 0x309   : > { %p1006_p13 = pneg %p1005_p4 }
 0x30a   : > { %p1012_p0 = por %p1011_p11, %p1010_p12 }
 0x30c   : > { %p1013_p5 = pnand %p1012_p0, %p1006_p13 }
 0x30e   : > { %1016 = shalt.err (!%p1013_p5)
}
 0x30f   : > { %s1535_s9 = scalar_lea.sflag [#allocation4], %s1319_s15  ;;  %s579_s22 = sshll.u32 %s1398_s19, 4  ;;  %v501_v37 = vpop.permute.xlu1 %500  ;;  %s1447_s22 = int_to_ptr.vmem [resolvable:$true] %s579_s22 }
 0x310   : > { %806 = dma.vmem_to_hbm [thread:$0]  (%p1266_p10), %s1407_s13, 512, %s1413_s14, %s1535_s9, %s1128_s30, %s1128_s30, %s1129_s18  }
 0x311   : > { %760 = vst.msk [vmem:[%s1398_s19 + $0x10] sm:$0xff] %vm464_vm2, %v501_v37  ;;  %s1453_s15 = scalar_lea.hbm %s1514_s7, %s1356_s20  ;;  %s1017_s17 = scalar_lea.vmem %s1447_s22, 512 }
 0x312   : > { %p1018_p9 = scmp.ne.s32.totalorder %s1447_s22, %s1017_s17  ;;  %s1131_s13 = smov [#allocation10]  }
 0x313   : > { %v516_v38 = vpop.permute.xlu1 %515  ;;  %s1021_s14 = sshll.u32 %s1131_s13, 4  ;;  %s1022_s14 = int_to_ptr.vmem [resolvable:$false] %s1021_s14 }
 0x314   : > { %763 = vst.msk [vmem:[%s1398_s19 + $0x18] sm:$0xff] %vm464_vm2, %v516_v38  ;;  %p1019_p1 = pnand %p1018_p9, %p1266_p10  ;;  %s1023_s12 = scalar_lea.vmem %s1022_s14, 1024 }
 0x315   : > { %p1024_p7 = scmp.lt.s32.totalorder %s1447_s22, %s1022_s14  ;;  %p1025_p3 = scmp.lt.s32.totalorder %s1023_s12, %s1017_s17 }
 0x316   : > { %p1020_p2 = pneg %p1019_p1 }
 0x317   : > { %p1026_p4 = por %p1025_p3, %p1024_p7 }
 0x319   : > { %p1027_p13 = pnand %p1026_p4, %p1020_p2 }
 0x31b   : > { %1030 = shalt.err (!%p1027_p13)
}
 0x31c   : > { %s1031_s20 = scalar_lea.hbm %s1453_s15, 512  ;;  %s1035_s3 = scalar_lea.hbm %s1514_s7, 1024 }
 0x31d   : > { %p1032_p6 = scmp.ne.s32.totalorder %s1453_s15, %s1031_s20  ;;  %p1036_p11 = scmp.lt.u32.totalorder %s1453_s15, %s1514_s7 }
 0x31e   : > { %p1037_p0 = scmp.lt.u32.totalorder %s1035_s3, %s1031_s20  ;;  %p1039_p9 = scmp.lt.u32.totalorder %s1031_s20, %s1453_s15 }
 0x31f   : > { %p1033_p8 = pnand %p1032_p6, %p1266_p10 }
 0x320   : > { %p1038_p5 = por %p1037_p0, %p1036_p11 }
 0x321   : > { %p1034_p12 = pneg %p1033_p8 }
 0x322   : > { %p1040_p1 = por %p1039_p9, %p1038_p5 }
 0x324   : > { %p1041_p2 = pnand %p1040_p1, %p1034_p12 }
 0x326   : > { %1044 = shalt.err (!%p1041_p2)
}
 0x327   : > { %808 = dma.vmem_to_hbm [thread:$0]  (%p1266_p10), %s1447_s22, 512, %s1453_s15, %s1370_s27, %s1128_s30, %s1128_s30, %s1129_s18  }
 0x328 PF: > { %s594_s8 = sand.u32 1, %s1087_s24   ;;  %p1536_p7 = scmp.ne.s32.totalorder %s1522_s10, 0 }
 0x329   : > { %p1537_p3 = scmp.ge.s32.totalorder %s1107_s29, 2  ;;  %s595_s17 = scalar_lea.sflag [#allocation4], %s594_s8 }
 0x32b   : > { %p821_p4 = pnand %p1537_p3, %p1536_p7 }
 0x32d   : > { %1078 = dma.done.wait (!%p821_p4), %s595_s17, 512  }
 0x32e   : > { %1080 = vsyncadd (!%p821_p4), %s595_s17, 4294966784  ;;  %s1538_s21 = sadd.s32 4294967294, %s1107_s29  }
 0x32f   : > { %s603_s13 = sand.u32 1, %s1538_s21  }
 0x330   : > { %s604_s14 = scalar_lea.sflag [#allocation9], %s603_s13 }
 0x331   : > { %1082 = dma.done.wait (!%p821_p4), %s604_s14, 1024  }
 0x332   : > { %1084 = vsyncadd (!%p821_p4), %s604_s14, 4294966272  ;;  %s28_s29 = sadd.s32 1, %s1107_s29   ;;  %s1539_s30 = sld [smem:[#allocation15_spill]] }
 0x333   : > { %p25_p10 = scmp.ge.s32.totalorder %s28_s29, 4   ;;  %s1540_s24 = smov %s1091_s25 }
 0x334   : > { %s1541_s25 = smov %s1095_s26  ;;  %s1542_s26 = smov %s1275_s23 }
 0x335   : > { %s1543_s27 = smov %s1103_s28  ;;  %27 = sbr.rel (!%p25_p10) target bundleno = 11 (0xb), region = 130 }
 0x338   : > { %s1544_s28 = smov %s1539_s30 }
 0x33c   :  { %618 = vsyncpa [#allocation3], 1 }
 0x33d   :  { %620 = vsyncpa [#allocation3 + $0x1], 1 }
 0x33e   :  { %621 = vsyncpa [#allocation6], 1 }
 0x33f   :  { %622 = vsyncpa [#allocation4], 1 }
 0x340   :  { %624 = vsyncpa [#allocation4 + $0x1], 1 }
 0x341   :  { %625 = vsyncpa [#allocation9], 1 }
 0x342   :  { %627 = vsyncpa [#allocation9 + $0x1], 1 }

</bundles_post_ra>
